<compile_context>
chip_gen: v7x
topology: tpu7x:2x2x1
jax: 0.10.0
libtpu: 0.0.40
codegen_flags: <defaults>
</compile_context>

<pallas_src>
import functools

import jax
import jax.numpy as jnp
from jax import lax
from jax.experimental import pallas as pl
from jax.experimental.pallas import tpu as pltpu


def _simclr_kernel(x_ref, out_ref, *, temp: float, row_tile: int, n_real: int):
    tm = row_tile
    n_pad, _ = x_ref.shape

    r0 = pl.program_id(0) * tm                      # global row offset (pair-aligned)
    if tm % 8 == 0:
        r0 = pl.multiple_of(r0, 8)                  # sublane-aligned slice hint

    xa = x_ref[...]                                 # [N, Dp], fully resident
    if tm == n_pad:
        xt = xa                                     # single tile: no slice needed
    else:
        xt = x_ref[pl.ds(r0, tm), :]                # [tm, Dp] row tile from resident x

    # sims[tm, N] = x_tile @ x^T. NT contraction (last dims) feeds the MXU directly.
    sims = lax.dot_general(
        xt, xa,
        dimension_numbers=(((1,), (1,)), ((), ())),
        preferred_element_type=jnp.float32,
    )

    # --- One fused full-width mask: diagonal + positive (same pair) + padded columns.
    col = lax.broadcasted_iota(jnp.int32, (tm, n_pad), 1)       # global column index
    lrow = lax.broadcasted_iota(jnp.int32, (tm, 1), 0)
    grow = lrow + r0                                            # [tm, 1] global row ids
    # columns {i, i^1} of row i  <=>  (col | 1) == (i | 1)
    mask = jnp.bitwise_or(col, 1) == jnp.bitwise_or(grow, 1)
    if n_pad > n_real:
        mask = jnp.logical_or(mask, col >= n_real)              # padded columns
    neg_big = -1e30                                             # finite: exp -> 0, no inf-inf
    masked = jnp.where(mask, neg_big, sims)                     # excludes diag, pos, pads

    # Single cross-lane max, reused for softmax shift and the accuracy test.
    max_rest = jnp.max(masked, axis=1, keepdims=True)           # [tm, 1]

    # --- Positive logit from the tiny [tm, tm] pair block (tm-wide work only).
    if tm == n_pad:
        blk = sims                                              # diag block == full sims
    else:
        blk = lax.dot_general(
            xt, xt,
            dimension_numbers=(((1,), (1,)), ((), ())),
            preferred_element_type=jnp.float32,
        )                                                       # [tm, tm]
    lcol_b = lax.broadcasted_iota(jnp.int32, (tm, tm), 1)
    lrow_b = lax.broadcasted_iota(jnp.int32, (tm, tm), 0)
    pos_sim = jnp.sum(
        jnp.where(lcol_b == jnp.bitwise_xor(lrow_b, 1), blk, 0.0),
        axis=1, keepdims=True)                                  # [tm, 1]

    # --- Softmax cross-entropy, with the positive term re-added analytically.
    inv_temp = 1.0 / float(temp)
    row_max = jnp.maximum(max_rest, pos_sim)                    # max over all non-diag cols
    sum_rest = jnp.sum(jnp.exp((masked - row_max) * inv_temp),
                       axis=1, keepdims=True)                   # excludes pos column
    denom = sum_rest + jnp.exp((pos_sim - row_max) * inv_temp)  # full softmax denominator
    loss_rows = jnp.log(denom) + (row_max - pos_sim) * inv_temp  # lse - pos_logit

    # Accuracy: positive strictly beats every other (non-diag) column.
    # Matches torch.argmax == label except on exact float ties between distinct rows.
    correct = (pos_sim > max_rest).astype(jnp.float32)

    if n_pad > n_real:                                          # zero padded rows' contributions
        valid = (grow < n_real).astype(jnp.float32)
        loss_rows = loss_rows * valid
        correct = correct * valid

    loss_part = jnp.sum(loss_rows)
    corr_part = jnp.sum(correct)

    # Merged lane-dense partials: sublane 0 -> loss sum, sublane 1 -> correct count.
    sub = lax.broadcasted_iota(jnp.int32, out_ref.shape, 1)
    out_ref[...] = jnp.where(sub == 0, loss_part,
                             jnp.where(sub == 1, corr_part, 0.0))


def _vmem_capacity_bytes() -> int:
    try:
        return int(pltpu.get_tpu_info().vmem_capacity_bytes)
    except Exception:
        return 64 * 1024 * 1024  # conservative: v7x per-TensorCore VMEM


def _choose_row_tile(n: int, dp: int, budget_bytes: int) -> int:
    """Largest row tile whose resident x + ~3 live [tm, N] f32 temporaries fit VMEM."""
    if n <= 512:
        return n  # single tile; block == full array dims
    f32 = 4
    for tm in (512, 256, 128, 64, 32, 16, 8):
        n_pad = ((n + tm - 1) // tm) * tm
        resident = 2 * n_pad * dp * f32          # worst case: double-buffered resident x
        temporaries = 3 * tm * n_pad * f32       # ~3 live [tm, N] f32 values
        small = 4 * tm * dp * f32 + tm * tm * f32
        if (tm * n_pad * f32 <= 8 * 1024 * 1024          # per-temporary cap (review: 6-8 MiB)
                and resident + temporaries + small <= budget_bytes):
            return tm
    return 8


def simclr_loss(projs: jax.Array, temp: float = 0.2, *, row_tile: int | None = None):
    """projs: [B, 2, D] -> (loss, acc) scalars, matching SimCLRLoss.forward."""
    b, two, d = projs.shape
    assert two == 2
    n = 2 * b
    x = projs.reshape(n, d)

    dp = ((d + 127) // 128) * 128                 # lane-pad the feature dim

    vmem_cap = _vmem_capacity_bytes()
    budget = int(vmem_cap * 0.78)                 # ~100 MiB on v5e/v6e, ~50 MiB on v7x

    if row_tile is None:
        tm = _choose_row_tile(n, dp, budget)
    else:
        tm = int(row_tile)
        assert tm >= 2 and tm % 2 == 0, "row_tile must be even (pairs must not split)"

    n_pad = ((n + tm - 1) // tm) * tm             # row-pad so any batch size works
    pad_rows, pad_cols = n_pad - n, dp - d
    if pad_rows or pad_cols:
        x = jnp.pad(x, ((0, pad_rows), (0, pad_cols)))

    g = n_pad // tm
    kernel = functools.partial(_simclr_kernel, temp=float(temp),
                               row_tile=tm, n_real=n)

    def run(single_buffer_resident: bool):
        if single_buffer_resident:
            # Resident operand never changes -> single buffer saves N*Dp*4 bytes of VMEM.
            resident_spec = pl.BlockSpec((n_pad, dp), lambda i: (0, 0),
                                         pipeline_mode=pl.Buffered(1))
        else:
            resident_spec = pl.BlockSpec((n_pad, dp), lambda i: (0, 0))
        return pl.pallas_call(
            kernel,
            grid=(g,),
            in_specs=[resident_spec],
            out_specs=pl.BlockSpec((1, 8, 128), lambda i: (i, 0, 0)),
            out_shape=jax.ShapeDtypeStruct((g, 8, 128), jnp.float32),
            compiler_params=pltpu.CompilerParams(
                # Row tiles are independent -> shard across v7x's 2 TensorCores.
                dimension_semantics=("parallel",),
                vmem_limit_bytes=budget,
            ),
        )(x)

    try:
        partials = run(True)
    except Exception:
        # pipeline_mode / Buffered(1) unsupported on this jax build -> default buffering.
        partials = run(False)

    loss = jnp.sum(partials[:, 0, 0]) / n
    acc = jnp.sum(partials[:, 1, 0]) / n
    return loss, acc


def _reference(projs: jax.Array, temp: float = 0.2):
    b, _, d = projs.shape
    n = 2 * b
    x = projs.reshape(n, d).astype(jnp.float32)
    sims = x @ x.T
    sims = sims.at[jnp.arange(n), jnp.arange(n)].set(-jnp.inf)
    labels = jnp.arange(n) ^ 1
    logits = sims / temp
    logp = jax.nn.log_softmax(logits, axis=1)
    loss = -jnp.mean(logp[jnp.arange(n), labels])
    acc = jnp.mean((jnp.argmax(sims, axis=1) == labels).astype(jnp.float32))
    return loss, acc


if __name__ == "__main__":
    key = jax.random.PRNGKey(0)

    # Case 1: tiny, single-tile path (same shape as before).
    B, D = 4, 32
    projs = jax.random.normal(key, (B, 2, D), dtype=jnp.float32)
    loss, acc = simclr_loss(projs, temp=0.2)
    jax.block_until_ready((loss, acc))
    ref_loss, ref_acc = _reference(projs, temp=0.2)
    assert jnp.allclose(loss, ref_loss, rtol=1e-4, atol=1e-4), (loss, ref_loss)
    assert jnp.allclose(acc, ref_acc), (acc, ref_acc)

    # Case 2: still small, but exercises the multi-tile grid + row-padding path
    # (N = 200 rows, row_tile = 128 -> padded to 256 rows, 2 grid steps).
    key2 = jax.random.split(key)[1]
    projs2 = jax.random.normal(key2, (100, 2, 40), dtype=jnp.float32)
    loss2, acc2 = simclr_loss(projs2, temp=0.2, row_tile=128)
    jax.block_until_ready((loss2, acc2))
    ref_loss2, ref_acc2 = _reference(projs2, temp=0.2)
    assert jnp.allclose(loss2, ref_loss2, rtol=1e-3, atol=1e-3), (loss2, ref_loss2)
    assert jnp.allclose(acc2, ref_acc2), (acc2, ref_acc2)

    print("KERNEL_OK")
</pallas_src>

<mosaic_0001>
module attributes {stable_mosaic.version = 11 : i64} {
  func.func @_simclr_kernel(%arg0: i32, %arg1: memref<8x128xf32, #tpu.memory_space<vmem>>, %arg2: memref<1x8x128xf32, #tpu.memory_space<vmem>>) attributes {dimension_semantics = [#tpu.dimension_semantics<parallel>], iteration_bounds = array<i64: 1>, scalar_prefetch = 0 : i64, scratch_operands = 0 : i64, tpu.core_type = #tpu.core_type<tc>, window_params = [{pipeline_mode = #tpu.pipeline_mode<synchronous>, transform_indices = @transform_0, window_bounds = array<i64: 8, 128>}, {transform_indices = @transform_1, window_bounds = array<i64: 1, 8, 128>}]} {
    %c8_i32 = arith.constant 8 : i32
    %0 = arith.muli %arg0, %c8_i32 : i32
    %1 = tpu.assume_multiple %0, 8 : i32
    %c0 = arith.constant 0 : index
    %c0_0 = arith.constant 0 : index
    %2 = vector.load %arg1[%c0, %c0_0] : memref<8x128xf32, #tpu.memory_space<vmem>>, vector<8x128xf32>
    %cst = arith.constant dense<0.000000e+00> : vector<8x8xf32>
    %3 = tpu.matmul %2, %2, %cst {dimension_numbers = #tpu.dot_dimension_numbers<[1], [1], [0], [0], [0, 0, 1, 0], [], []>} : vector<8x128xf32>, vector<8x128xf32>, vector<8x8xf32> -> vector<8x8xf32>
    %4 = tpu.iota {dimensions = array<i32: 1>} : vector<8x8xi32>
    %5 = tpu.iota {dimensions = array<i32: 0>} : vector<8x1xi32>
    %6 = vector.broadcast %1 : i32 to vector<8x1xi32>
    %7 = arith.addi %5, %6 : vector<8x1xi32>
    %c1_i32 = arith.constant 1 : i32
    %8 = vector.broadcast %c1_i32 : i32 to vector<8x8xi32>
    %9 = arith.ori %4, %8 : vector<8x8xi32>
    %c1_i32_1 = arith.constant 1 : i32
    %10 = vector.broadcast %c1_i32_1 : i32 to vector<8x1xi32>
    %11 = arith.ori %7, %10 : vector<8x1xi32>
    %12 = vector.broadcast %11 : vector<8x1xi32> to vector<8x8xi32>
    %13 = arith.cmpi eq, %9, %12 : vector<8x8xi32>
    %cst_2 = arith.constant -1.000000e+30 : f32
    %14 = vector.broadcast %cst_2 : f32 to vector<8x8xf32>
    %15 = arith.select %13, %14, %3 : vector<8x8xi1>, vector<8x8xf32>
    %cst_3 = arith.constant dense<0xFF800000> : vector<8xf32>
    %16 = vector.multi_reduction <maximumf>, %15, %cst_3 [1] : vector<8x8xf32> to vector<8xf32>
    %17 = vector.shape_cast %16 : vector<8xf32> to vector<8x1xf32>
    %18 = tpu.iota {dimensions = array<i32: 1>} : vector<8x8xi32>
    %19 = tpu.iota {dimensions = array<i32: 0>} : vector<8x8xi32>
    %c1_i32_4 = arith.constant 1 : i32
    %20 = vector.broadcast %c1_i32_4 : i32 to vector<8x8xi32>
    %21 = arith.xori %19, %20 : vector<8x8xi32>
    %22 = arith.cmpi eq, %18, %21 : vector<8x8xi32>
    %cst_5 = arith.constant 0.000000e+00 : f32
    %23 = vector.broadcast %cst_5 : f32 to vector<8x8xf32>
    %24 = arith.select %22, %3, %23 : vector<8x8xi1>, vector<8x8xf32>
    %cst_6 = arith.constant dense<0.000000e+00> : vector<8xf32>
    %25 = vector.multi_reduction <add>, %24, %cst_6 [1] : vector<8x8xf32> to vector<8xf32>
    %26 = vector.shape_cast %25 : vector<8xf32> to vector<8x1xf32>
    %27 = arith.maximumf %17, %26 : vector<8x1xf32>
    %28 = vector.broadcast %27 : vector<8x1xf32> to vector<8x8xf32>
    %29 = arith.subf %15, %28 : vector<8x8xf32>
    %cst_7 = arith.constant 5.000000e+00 : f32
    %30 = vector.broadcast %cst_7 : f32 to vector<8x8xf32>
    %31 = arith.mulf %29, %30 : vector<8x8xf32>
    %32 = math.exp %31 : vector<8x8xf32>
    %cst_8 = arith.constant dense<0.000000e+00> : vector<8xf32>
    %33 = vector.multi_reduction <add>, %32, %cst_8 [1] : vector<8x8xf32> to vector<8xf32>
    %34 = vector.shape_cast %33 : vector<8xf32> to vector<8x1xf32>
    %35 = arith.subf %26, %27 : vector<8x1xf32>
    %cst_9 = arith.constant 5.000000e+00 : f32
    %36 = vector.broadcast %cst_9 : f32 to vector<8x1xf32>
    %37 = arith.mulf %35, %36 : vector<8x1xf32>
    %38 = math.exp %37 : vector<8x1xf32>
    %39 = arith.addf %34, %38 : vector<8x1xf32>
    %40 = math.log %39 : vector<8x1xf32>
    %41 = arith.subf %27, %26 : vector<8x1xf32>
    %cst_10 = arith.constant 5.000000e+00 : f32
    %42 = vector.broadcast %cst_10 : f32 to vector<8x1xf32>
    %43 = arith.mulf %41, %42 : vector<8x1xf32>
    %44 = arith.addf %40, %43 : vector<8x1xf32>
    %45 = arith.cmpf ogt, %26, %17 : vector<8x1xf32>
    %46 = arith.extui %45 : vector<8x1xi1> to vector<8x1xi32>
    %47 = arith.sitofp %46 : vector<8x1xi32> to vector<8x1xf32>
    %48 = vector.shape_cast %44 : vector<8x1xf32> to vector<1x8x1xf32>
    %cst_11 = arith.constant dense<0.000000e+00> : vector<1xf32>
    %49 = vector.multi_reduction <add>, %48, %cst_11 [1, 2] : vector<1x8x1xf32> to vector<1xf32>
    %50 = vector.shape_cast %49 : vector<1xf32> to vector<1x1x1xf32>
    %51 = vector.extract %50[0, 0, 0] : f32 from vector<1x1x1xf32>
    %52 = vector.shape_cast %47 : vector<8x1xf32> to vector<1x8x1xf32>
    %cst_12 = arith.constant dense<0.000000e+00> : vector<1xf32>
    %53 = vector.multi_reduction <add>, %52, %cst_12 [1, 2] : vector<1x8x1xf32> to vector<1xf32>
    %54 = vector.shape_cast %53 : vector<1xf32> to vector<1x1x1xf32>
    %55 = vector.extract %54[0, 0, 0] : f32 from vector<1x1x1xf32>
    %56 = tpu.iota {dimensions = array<i32: 1>} : vector<1x8x128xi32>
    %c0_i32 = arith.constant 0 : i32
    %57 = vector.broadcast %c0_i32 : i32 to vector<1x8x128xi32>
    %58 = arith.cmpi eq, %56, %57 : vector<1x8x128xi32>
    %c1_i32_13 = arith.constant 1 : i32
    %59 = vector.broadcast %c1_i32_13 : i32 to vector<1x8x128xi32>
    %60 = arith.cmpi eq, %56, %59 : vector<1x8x128xi32>
    %cst_14 = arith.constant 0.000000e+00 : f32
    %61 = vector.broadcast %55 : f32 to vector<1x8x128xf32>
    %62 = vector.broadcast %cst_14 : f32 to vector<1x8x128xf32>
    %63 = arith.select %60, %61, %62 : vector<1x8x128xi1>, vector<1x8x128xf32>
    %64 = vector.broadcast %51 : f32 to vector<1x8x128xf32>
    %65 = arith.select %58, %64, %63 : vector<1x8x128xi1>, vector<1x8x128xf32>
    %c0_15 = arith.constant 0 : index
    %c0_16 = arith.constant 0 : index
    %c0_17 = arith.constant 0 : index
    %66 = vector.load %arg2[%c0_15, %c0_16, %c0_17] : memref<1x8x128xf32, #tpu.memory_space<vmem>>, vector<1x8x128xf32>
    tpu.vector_store %arg2[%c0_15, %c0_16, %c0_17], %65 {strides = array<i32>} : memref<1x8x128xf32, #tpu.memory_space<vmem>>, vector<1x8x128xf32>,
    return
  }
  func.func @transform_0(%arg0: i32) -> (i32, i32) {
    %c0_i32 = arith.constant 0 : i32
    %c0_i32_0 = arith.constant 0 : i32
    %c0_i32_1 = arith.constant 0 : i32
    return %c0_i32, %c0_i32_0 : i32, i32
  }
  func.func @transform_1(%arg0: i32) -> (i32, i32, i32) {
    %c0_i32 = arith.constant 0 : i32
    %c0_i32_0 = arith.constant 0 : i32
    %c0_i32_1 = arith.constant 0 : i32
    return %arg0, %c0_i32, %c0_i32_0 : i32, i32, i32
  }
}

module attributes {stable_mosaic.version = 11 : i64} {
  func.func @_simclr_kernel(%arg0: i32, %arg1: memref<8x128xf32, #tpu.memory_space<vmem>>, %arg2: memref<1x8x128xf32, #tpu.memory_space<vmem>>) attributes {dimension_semantics = [#tpu.dimension_semantics<parallel>], iteration_bounds = array<i64: 1>, scalar_prefetch = 0 : i64, scratch_operands = 0 : i64, tpu.core_type = #tpu.core_type<tc>, window_params = [{pipeline_mode = #tpu.pipeline_mode<synchronous>, transform_indices = @transform_0, window_bounds = array<i64: 8, 128>}, {transform_indices = @transform_1, window_bounds = array<i64: 1, 8, 128>}]} {
    %c8_i32 = arith.constant 8 : i32
    %0 = arith.muli %arg0, %c8_i32 : i32
    %1 = tpu.assume_multiple %0, 8 : i32
    %c0 = arith.constant 0 : index
    %c0_0 = arith.constant 0 : index
    %2 = vector.load %arg1[%c0, %c0_0] : memref<8x128xf32, #tpu.memory_space<vmem>>, vector<8x128xf32>
    %cst = arith.constant dense<0.000000e+00> : vector<8x8xf32>
    %3 = tpu.matmul %2, %2, %cst {dimension_numbers = #tpu.dot_dimension_numbers<[1], [1], [0], [0], [0, 0, 1, 0], [], []>} : vector<8x128xf32>, vector<8x128xf32>, vector<8x8xf32> -> vector<8x8xf32>
    %4 = tpu.iota {dimensions = array<i32: 1>} : vector<8x8xi32>
    %5 = tpu.iota {dimensions = array<i32: 0>} : vector<8x1xi32>
    %6 = vector.broadcast %1 : i32 to vector<8x1xi32>
    %7 = arith.addi %5, %6 : vector<8x1xi32>
    %c1_i32 = arith.constant 1 : i32
    %8 = vector.broadcast %c1_i32 : i32 to vector<8x8xi32>
    %9 = arith.ori %4, %8 : vector<8x8xi32>
    %c1_i32_1 = arith.constant 1 : i32
    %10 = vector.broadcast %c1_i32_1 : i32 to vector<8x1xi32>
    %11 = arith.ori %7, %10 : vector<8x1xi32>
    %12 = vector.broadcast %11 : vector<8x1xi32> to vector<8x8xi32>
    %13 = arith.cmpi eq, %9, %12 : vector<8x8xi32>
    %cst_2 = arith.constant -1.000000e+30 : f32
    %14 = vector.broadcast %cst_2 : f32 to vector<8x8xf32>
    %15 = arith.select %13, %14, %3 : vector<8x8xi1>, vector<8x8xf32>
    %cst_3 = arith.constant dense<0xFF800000> : vector<8xf32>
    %16 = vector.multi_reduction <maximumf>, %15, %cst_3 [1] : vector<8x8xf32> to vector<8xf32>
    %17 = vector.shape_cast %16 : vector<8xf32> to vector<8x1xf32>
    %18 = tpu.iota {dimensions = array<i32: 1>} : vector<8x8xi32>
    %19 = tpu.iota {dimensions = array<i32: 0>} : vector<8x8xi32>
    %c1_i32_4 = arith.constant 1 : i32
    %20 = vector.broadcast %c1_i32_4 : i32 to vector<8x8xi32>
    %21 = arith.xori %19, %20 : vector<8x8xi32>
    %22 = arith.cmpi eq, %18, %21 : vector<8x8xi32>
    %cst_5 = arith.constant 0.000000e+00 : f32
    %23 = vector.broadcast %cst_5 : f32 to vector<8x8xf32>
    %24 = arith.select %22, %3, %23 : vector<8x8xi1>, vector<8x8xf32>
    %cst_6 = arith.constant dense<0.000000e+00> : vector<8xf32>
    %25 = vector.multi_reduction <add>, %24, %cst_6 [1] : vector<8x8xf32> to vector<8xf32>
    %26 = vector.shape_cast %25 : vector<8xf32> to vector<8x1xf32>
    %27 = arith.maximumf %17, %26 : vector<8x1xf32>
    %28 = vector.broadcast %27 : vector<8x1xf32> to vector<8x8xf32>
    %29 = arith.subf %15, %28 : vector<8x8xf32>
    %cst_7 = arith.constant 5.000000e+00 : f32
    %30 = vector.broadcast %cst_7 : f32 to vector<8x8xf32>
    %31 = arith.mulf %29, %30 : vector<8x8xf32>
    %32 = math.exp %31 : vector<8x8xf32>
    %cst_8 = arith.constant dense<0.000000e+00> : vector<8xf32>
    %33 = vector.multi_reduction <add>, %32, %cst_8 [1] : vector<8x8xf32> to vector<8xf32>
    %34 = vector.shape_cast %33 : vector<8xf32> to vector<8x1xf32>
    %35 = arith.subf %26, %27 : vector<8x1xf32>
    %cst_9 = arith.constant 5.000000e+00 : f32
    %36 = vector.broadcast %cst_9 : f32 to vector<8x1xf32>
    %37 = arith.mulf %35, %36 : vector<8x1xf32>
    %38 = math.exp %37 : vector<8x1xf32>
    %39 = arith.addf %34, %38 : vector<8x1xf32>
    %40 = math.log %39 : vector<8x1xf32>
    %41 = arith.subf %27, %26 : vector<8x1xf32>
    %cst_10 = arith.constant 5.000000e+00 : f32
    %42 = vector.broadcast %cst_10 : f32 to vector<8x1xf32>
    %43 = arith.mulf %41, %42 : vector<8x1xf32>
    %44 = arith.addf %40, %43 : vector<8x1xf32>
    %45 = arith.cmpf ogt, %26, %17 : vector<8x1xf32>
    %46 = arith.extui %45 : vector<8x1xi1> to vector<8x1xi32>
    %47 = arith.sitofp %46 : vector<8x1xi32> to vector<8x1xf32>
    %48 = vector.shape_cast %44 : vector<8x1xf32> to vector<1x8x1xf32>
    %cst_11 = arith.constant dense<0.000000e+00> : vector<1xf32>
    %49 = vector.multi_reduction <add>, %48, %cst_11 [1, 2] : vector<1x8x1xf32> to vector<1xf32>
    %50 = vector.shape_cast %49 : vector<1xf32> to vector<1x1x1xf32>
    %51 = vector.extract %50[0, 0, 0] : f32 from vector<1x1x1xf32>
    %52 = vector.shape_cast %47 : vector<8x1xf32> to vector<1x8x1xf32>
    %cst_12 = arith.constant dense<0.000000e+00> : vector<1xf32>
    %53 = vector.multi_reduction <add>, %52, %cst_12 [1, 2] : vector<1x8x1xf32> to vector<1xf32>
    %54 = vector.shape_cast %53 : vector<1xf32> to vector<1x1x1xf32>
    %55 = vector.extract %54[0, 0, 0] : f32 from vector<1x1x1xf32>
    %56 = tpu.iota {dimensions = array<i32: 1>} : vector<1x8x128xi32>
    %c0_i32 = arith.constant 0 : i32
    %57 = vector.broadcast %c0_i32 : i32 to vector<1x8x128xi32>
    %58 = arith.cmpi eq, %56, %57 : vector<1x8x128xi32>
    %c1_i32_13 = arith.constant 1 : i32
    %59 = vector.broadcast %c1_i32_13 : i32 to vector<1x8x128xi32>
    %60 = arith.cmpi eq, %56, %59 : vector<1x8x128xi32>
    %cst_14 = arith.constant 0.000000e+00 : f32
    %61 = vector.broadcast %55 : f32 to vector<1x8x128xf32>
    %62 = vector.broadcast %cst_14 : f32 to vector<1x8x128xf32>
    %63 = arith.select %60, %61, %62 : vector<1x8x128xi1>, vector<1x8x128xf32>
    %64 = vector.broadcast %51 : f32 to vector<1x8x128xf32>
    %65 = arith.select %58, %64, %63 : vector<1x8x128xi1>, vector<1x8x128xf32>
    %c0_15 = arith.constant 0 : index
    %c0_16 = arith.constant 0 : index
    %c0_17 = arith.constant 0 : index
    %66 = vector.load %arg2[%c0_15, %c0_16, %c0_17] : memref<1x8x128xf32, #tpu.memory_space<vmem>>, vector<1x8x128xf32>
    tpu.vector_store %arg2[%c0_15, %c0_16, %c0_17], %65 {strides = array<i32>} : memref<1x8x128xf32, #tpu.memory_space<vmem>>, vector<1x8x128xf32>,
    return
  }
  func.func @transform_0(%arg0: i32) -> (i32, i32) {
    %c0_i32 = arith.constant 0 : i32
    %c0_i32_0 = arith.constant 0 : i32
    %c0_i32_1 = arith.constant 0 : i32
    return %c0_i32, %c0_i32_0 : i32, i32
  }
  func.func @transform_1(%arg0: i32) -> (i32, i32, i32) {
    %c0_i32 = arith.constant 0 : i32
    %c0_i32_0 = arith.constant 0 : i32
    %c0_i32_1 = arith.constant 0 : i32
    return %arg0, %c0_i32, %c0_i32_0 : i32, i32, i32
  }
}

</mosaic_0001>

<bundles_post_ra>
// kernel: tpu_custom_call.1
= control target key start
LH: loop header
LB: loop body
LE: loop exit
PB: predicated region body
PF: predicated region fallthrough
CT: control target
= control target key end

     0   :  { %6 = vsyncpa [#allocation3], 0  ;;  %s296_s0 = inlined_call_operand.hbm [shape: f32[8,128], index: 0, kind: input, shape index: {}]   ;;  %s297_s1 = inlined_call_operand.hbm [shape: f32[1,8,128], index: 1, kind: output, shape index: {}]  }
   0x1   :  { %7 = vsyncpa [#allocation4], 0  ;;  %s247_s6 = smov [#allocation2]   ;;  %s199_s10 = scalar_lea.hbm %s296_s0, 128 }
   0x2   :  { %s14_s7 = sshll.u32 %s247_s6, 4  ;;  %p200_p0 = scmp.ne.s32.totalorder %s296_s0, %s199_s10  ;;  %s15_s7 = int_to_ptr.vmem [resolvable:$true] %s14_s7 }
   0x3   :  { %p203_p1 = scmp.lt.u32.totalorder %s199_s10, %s296_s0 }
   0x5   :  { %p205_p2 = pnand %p203_p1, %p200_p0 }
   0x7   :  { %208 = shalt.err (!%p205_p2)
}
   0x8   :  { %s209_s15 = scalar_lea.vmem %s15_s7, 128  ;;  %p214_p4 = scmp.lt.s32.totalorder %s15_s7, %s15_s7 }
   0x9   :  { %p210_p3 = scmp.ne.s32.totalorder %s15_s7, %s209_s15  ;;  %p215_p5 = scmp.lt.s32.totalorder %s209_s15, %s209_s15 }
   0xb   :  { %p216_p6 = por %p215_p5, %p214_p4 }
   0xd   :  { %p217_p7 = pnand %p216_p6, %p210_p3 }
   0xf   :  { %220 = shalt.err (!%p217_p7)
}
  0x10   :  { %17 = dma.hbm_to_vmem [thread:$0]  %s296_s0, 128, %s15_s7, [#allocation3]  }
  0x11   :  { %243 = dma.done.wait [#allocation3], 128  }
  0x12   :  { %244 = vsyncadd [#allocation3], 4294967168  ;;  %v248_v0 = vmov 0.0   ;;  %vm249_vm0 = vmmov 0   ;;  %v22_v1 = vld [vmem:[#allocation2] sm:$0xff]  ;;  %v93_v2 = vlaneseq  ;;  %vm103_vm2 = vcmask 64512  }
  0x13   :  { %180 = vmatprep.subr.mxu0 %v248_v0  ;;  %182 = vmatprep.mubr.msk.f32.mxu0 %vm249_vm0, %v248_v0  ;;  %vm134_vm4 = vcmask 7168   ;;  %s250_s18 = smov [#allocation5]  }
  0x14   :  { %181 = vmatpush3.xpose.msra.mxu0 %v22_v1  ;;  %v94_v3 = vand.u32 127, %v93_v2  ;;  %v273_v4 = vshrl.u32 %v93_v2, 7  ;;  %s168_s19 = sshll.u32 %s250_s18, 4  ;;  %s169_s19 = int_to_ptr.vmem [resolvable:$true] %s168_s19 }
  0x15   :  { %s221_s21 = scalar_lea.vmem %s169_s19, 128  ;;  %p226_p9 = scmp.lt.s32.totalorder %s169_s19, %s169_s19 }
  0x16   :  { %v99_v5 = vor.u32 1, %v94_v3  ;;  %v100_v6 = vor.u32 1, %v273_v4  ;;  %v107_v7 = vxor.u32 1, %v273_v4  ;;  %vm156_vm6 = vcmp.eq.s32.totalorder %v273_v4, 1  ;;  %p222_p8 = scmp.ne.s32.totalorder %s169_s19, %s221_s21  ;;  %p227_p10 = scmp.lt.s32.totalorder %s221_s21, %s221_s21 }
  0x17   :  { %183 = vmatmul.mubr.f32.vlgmr.msra.gmra.mrb[0].mxu0 %v22_v1  ;;  %vm155_vm7 = vcmp.eq.s32.totalorder %v273_v4, 0 }
  0x18   :  { %vm101_vm1 = vcmp.eq.s32.totalorder %v99_v5, %v100_v6  ;;  %vm108_vm3 = vcmp.eq.s32.totalorder %v94_v3, %v107_v7  ;;  %p228_p11 = por %p227_p10, %p226_p9 }
  0x1a   :  { %p229_p12 = pnand %p228_p11, %p222_p8 }
  0xea   :  { %v89_v8 = vpop.f32.mrb[0].mxu0 }
  0xeb   :  { %v184_v9 = vpop.f32.mrb[1].mxu0  ;;  %v102_v10 = vsel %vm101_vm1, -1e+30, %v89_v8  ;;  %v109_v12 = vsel %vm108_vm3, %v89_v8, 0.0 }
  0xec   :  { %v104_v11 = vsel %vm103_vm2, %v102_v10, -inf  ;;  %v110_v13 = vsel %vm103_vm2, %v109_v12, 0.0 }
  0xed   :  { %105 = vmax.xlane.f32.xlu0 %v104_v11 }
  0xf1   :  { %111 = vadd.xlane.f32.xlu0 %v110_v13 }
 0x17a   :  { %v106_v14 = vpop.xlane.xlu0 %105 }
 0x17e   :  { %v112_v15 = vpop.xlane.xlu0 %111 }
 0x17f   :  { %v113_v16 = vmax.f32 %v106_v14, %v112_v15  ;;  %vm131_vm5 = vcmp.gt.f32.partialorder %v112_v15, %v106_v14 }
 0x180   :  { %v177_v17 = vsel %vm131_vm5, 1.0, %v248_v0 }
 0x181   :  { %v114_v18 = vsub.f32 %v102_v10, %v113_v16  ;;  %v145_v19 = vsel %vm134_vm4, %v177_v17, 0.0  ;;  %v121_v24 = vsub.f32 %v112_v15, %v113_v16  ;;  %v128_v30 = vsub.f32 %v113_v16, %v112_v15 }
 0x182   :  { %146 = vadd.xlane.f32.xlu0 %v145_v19 }
 0x183   :  { %v115_v20 = vmul.f32 5.0, %v114_v18  ;;  %v122_v25 = vmul.f32 5.0, %v121_v24  ;;  %v129_v33 = vmul.f32 5.0, %v128_v30 }
 0x185   :  { %v116_v21 = vmul.f32 1.442695, %v115_v20  ;;  %v123_v26 = vmul.f32 1.442695, %v122_v25 }
 0x187   :  { %193 = vpow2.f32 %v116_v21 }
 0x188   :  { %195 = vpow2.f32 %v123_v26 }
 0x191   :  { %v194_v22 = vpop.eup %193 }
 0x192   :  { %v118_v23 = vsel %vm103_vm2, %v194_v22, 0.0  ;;  %v196_v27 = vpop.eup %195 }
 0x193   :  { %119 = vadd.xlane.f32.xlu1 %v118_v23 }
 0x20f   :  { %v147_v36 = vpop.xlane.xlu0 %146 }
 0x210   :  { %v148_v37 = vrot.slane %v147_v36, 4 }
 0x212   :  { %v149_v38 = vadd.f32 %v148_v37, %v147_v36 }
 0x214   :  { %v150_v39 = vrot.slane %v149_v38, 2 }
 0x216   :  { %v151_v43 = vadd.f32 %v150_v39, %v149_v38 }
 0x218   :  { %v152_v46 = vrot.slane %v151_v43, 1 }
 0x21a   :  { %v153_v49 = vadd.f32 %v152_v46, %v151_v43 }
 0x220   :  { %v120_v28 = vpop.xlane.xlu1 %119 }
 0x221   :  { %v125_v29 = vadd.f32 %v196_v27, %v120_v28 }
 0x223   :  { %197 = vlog2.f32 %v125_v29 }
 0x22d   :  { %v198_v31 = vpop.eup %197 }
 0x22e   :  { %v127_v32 = vmul.f32 0.6931472, %v198_v31 }
 0x230   :  { %v130_v34 = vadd.f32 %v129_v33, %v127_v32 }
 0x232   :  { %v135_v35 = vsel %vm134_vm4, %v130_v34, 0.0 }
 0x233   :  { %136 = vadd.xlane.f32.xlu1 %v135_v35 }
 0x2c0   :  { %v137_v40 = vpop.xlane.xlu1 %136 }
 0x2c1   :  { %v138_v41 = vrot.slane %v137_v40, 4 }
 0x2c3   :  { %v139_v42 = vadd.f32 %v138_v41, %v137_v40 }
 0x2c5   :  { %v140_v44 = vrot.slane %v139_v42, 2 }
 0x2c7   :  { %v141_v45 = vadd.f32 %v140_v44, %v139_v42 }
 0x2c9   :  { %v142_v47 = vrot.slane %v141_v45, 1 }
 0x2cb   :  { %v143_v48 = vadd.f32 %v142_v47, %v141_v45 }
 0x2cd   :  { %185 = vpush %v143_v48 }
 0x2ce   :  { %187 = vpush %v153_v49 }
 0x2fe   :  { %s186_s0 = spop %185 }
 0x2ff   :  { %v159_v50 = vstv %s186_s0  ;;  %s188_s20 = spop %187 }
 0x300   :  { %v157_v51 = vstv %s188_s20 }
 0x301   :  { %v158_v52 = vsel %vm156_vm6, %v157_v51, 0.0 }
 0x302   :  { %v160_v53 = vsel %vm155_vm7, %v159_v50, %v158_v52 }
 0x303   :  { %161 = vst [vmem:[#allocation5] sm:$0xff] %v160_v53 }
 0x304   :  { %232 = shalt.err (!%p229_p12)
}
 0x305   :  { %s233_s24 = scalar_lea.hbm %s297_s1, 128 }
 0x306   :  { %p234_p13 = scmp.ne.s32.totalorder %s297_s1, %s233_s24  ;;  %p237_p0 = scmp.lt.u32.totalorder %s233_s24, %s297_s1 }
 0x308   :  { %p239_p1 = pnand %p237_p0, %p234_p13 }
 0x30a   :  { %242 = shalt.err (!%p239_p1)
}
 0x30b   :  { %171 = dma.vmem_to_hbm [thread:$0]  %s169_s19, 128, %s297_s1, [#allocation4]  }
 0x30c   :  { %245 = dma.done.wait [#allocation4], 128  }
 0x30d   :  { %246 = vsyncadd [#allocation4], 4294967168 }
 0x30e   :  { %175 = vsyncpa [#allocation3], 1 }
 0x30f   :  { %176 = vsyncpa [#allocation4], 1 }

// kernel: tpu_custom_call.1
= control target key start
LH: loop header
LB: loop body
LE: loop exit
PB: predicated region body
PF: predicated region fallthrough
CT: control target
= control target key end

     0   :  { %6 = vsyncpa [#allocation3], 0  ;;  %s296_s0 = inlined_call_operand.hbm [shape: f32[8,128], index: 0, kind: input, shape index: {}]   ;;  %s297_s1 = inlined_call_operand.hbm [shape: f32[1,8,128], index: 1, kind: output, shape index: {}]  }
   0x1   :  { %7 = vsyncpa [#allocation4], 0  ;;  %s247_s6 = smov [#allocation2]   ;;  %s199_s10 = scalar_lea.hbm %s296_s0, 128 }
   0x2   :  { %s14_s7 = sshll.u32 %s247_s6, 4  ;;  %p200_p0 = scmp.ne.s32.totalorder %s296_s0, %s199_s10  ;;  %s15_s7 = int_to_ptr.vmem [resolvable:$true] %s14_s7 }
   0x3   :  { %p203_p1 = scmp.lt.u32.totalorder %s199_s10, %s296_s0 }
   0x5   :  { %p205_p2 = pnand %p203_p1, %p200_p0 }
   0x7   :  { %208 = shalt.err (!%p205_p2)
}
   0x8   :  { %s209_s15 = scalar_lea.vmem %s15_s7, 128  ;;  %p214_p4 = scmp.lt.s32.totalorder %s15_s7, %s15_s7 }
   0x9   :  { %p210_p3 = scmp.ne.s32.totalorder %s15_s7, %s209_s15  ;;  %p215_p5 = scmp.lt.s32.totalorder %s209_s15, %s209_s15 }
   0xb   :  { %p216_p6 = por %p215_p5, %p214_p4 }
   0xd   :  { %p217_p7 = pnand %p216_p6, %p210_p3 }
   0xf   :  { %220 = shalt.err (!%p217_p7)
}
  0x10   :  { %17 = dma.hbm_to_vmem [thread:$0]  %s296_s0, 128, %s15_s7, [#allocation3]  }
  0x11   :  { %243 = dma.done.wait [#allocation3], 128  }
  0x12   :  { %244 = vsyncadd [#allocation3], 4294967168  ;;  %v248_v0 = vmov 0.0   ;;  %vm249_vm0 = vmmov 0   ;;  %v22_v1 = vld [vmem:[#allocation2] sm:$0xff]  ;;  %v93_v2 = vlaneseq  ;;  %vm103_vm2 = vcmask 64512  }
  0x13   :  { %180 = vmatprep.subr.mxu0 %v248_v0  ;;  %182 = vmatprep.mubr.msk.f32.mxu0 %vm249_vm0, %v248_v0  ;;  %vm134_vm4 = vcmask 7168   ;;  %s250_s18 = smov [#allocation5]  }
  0x14   :  { %181 = vmatpush3.xpose.msra.mxu0 %v22_v1  ;;  %v94_v3 = vand.u32 127, %v93_v2  ;;  %v273_v4 = vshrl.u32 %v93_v2, 7  ;;  %s168_s19 = sshll.u32 %s250_s18, 4  ;;  %s169_s19 = int_to_ptr.vmem [resolvable:$true] %s168_s19 }
  0x15   :  { %s221_s21 = scalar_lea.vmem %s169_s19, 128  ;;  %p226_p9 = scmp.lt.s32.totalorder %s169_s19, %s169_s19 }
  0x16   :  { %v99_v5 = vor.u32 1, %v94_v3  ;;  %v100_v6 = vor.u32 1, %v273_v4  ;;  %v107_v7 = vxor.u32 1, %v273_v4  ;;  %vm156_vm6 = vcmp.eq.s32.totalorder %v273_v4, 1  ;;  %p222_p8 = scmp.ne.s32.totalorder %s169_s19, %s221_s21  ;;  %p227_p10 = scmp.lt.s32.totalorder %s221_s21, %s221_s21 }
  0x17   :  { %183 = vmatmul.mubr.f32.vlgmr.msra.gmra.mrb[0].mxu0 %v22_v1  ;;  %vm155_vm7 = vcmp.eq.s32.totalorder %v273_v4, 0 }
  0x18   :  { %vm101_vm1 = vcmp.eq.s32.totalorder %v99_v5, %v100_v6  ;;  %vm108_vm3 = vcmp.eq.s32.totalorder %v94_v3, %v107_v7  ;;  %p228_p11 = por %p227_p10, %p226_p9 }
  0x1a   :  { %p229_p12 = pnand %p228_p11, %p222_p8 }
  0xea   :  { %v89_v8 = vpop.f32.mrb[0].mxu0 }
  0xeb   :  { %v184_v9 = vpop.f32.mrb[1].mxu0  ;;  %v102_v10 = vsel %vm101_vm1, -1e+30, %v89_v8  ;;  %v109_v12 = vsel %vm108_vm3, %v89_v8, 0.0 }
  0xec   :  { %v104_v11 = vsel %vm103_vm2, %v102_v10, -inf  ;;  %v110_v13 = vsel %vm103_vm2, %v109_v12, 0.0 }
  0xed   :  { %105 = vmax.xlane.f32.xlu0 %v104_v11 }
  0xf1   :  { %111 = vadd.xlane.f32.xlu0 %v110_v13 }
 0x17a   :  { %v106_v14 = vpop.xlane.xlu0 %105 }
 0x17e   :  { %v112_v15 = vpop.xlane.xlu0 %111 }
 0x17f   :  { %v113_v16 = vmax.f32 %v106_v14, %v112_v15  ;;  %vm131_vm5 = vcmp.gt.f32.partialorder %v112_v15, %v106_v14 }
 0x180   :  { %v177_v17 = vsel %vm131_vm5, 1.0, %v248_v0 }
 0x181   :  { %v114_v18 = vsub.f32 %v102_v10, %v113_v16  ;;  %v145_v19 = vsel %vm134_vm4, %v177_v17, 0.0  ;;  %v121_v24 = vsub.f32 %v112_v15, %v113_v16  ;;  %v128_v30 = vsub.f32 %v113_v16, %v112_v15 }
 0x182   :  { %146 = vadd.xlane.f32.xlu0 %v145_v19 }
 0x183   :  { %v115_v20 = vmul.f32 5.0, %v114_v18  ;;  %v122_v25 = vmul.f32 5.0, %v121_v24  ;;  %v129_v33 = vmul.f32 5.0, %v128_v30 }
 0x185   :  { %v116_v21 = vmul.f32 1.442695, %v115_v20  ;;  %v123_v26 = vmul.f32 1.442695, %v122_v25 }
 0x187   :  { %193 = vpow2.f32 %v116_v21 }
 0x188   :  { %195 = vpow2.f32 %v123_v26 }
 0x191   :  { %v194_v22 = vpop.eup %193 }
 0x192   :  { %v118_v23 = vsel %vm103_vm2, %v194_v22, 0.0  ;;  %v196_v27 = vpop.eup %195 }
 0x193   :  { %119 = vadd.xlane.f32.xlu1 %v118_v23 }
 0x20f   :  { %v147_v36 = vpop.xlane.xlu0 %146 }
 0x210   :  { %v148_v37 = vrot.slane %v147_v36, 4 }
 0x212   :  { %v149_v38 = vadd.f32 %v148_v37, %v147_v36 }
 0x214   :  { %v150_v39 = vrot.slane %v149_v38, 2 }
 0x216   :  { %v151_v43 = vadd.f32 %v150_v39, %v149_v38 }
 0x218   :  { %v152_v46 = vrot.slane %v151_v43, 1 }
 0x21a   :  { %v153_v49 = vadd.f32 %v152_v46, %v151_v43 }
 0x220   :  { %v120_v28 = vpop.xlane.xlu1 %119 }
 0x221   :  { %v125_v29 = vadd.f32 %v196_v27, %v120_v28 }
 0x223   :  { %197 = vlog2.f32 %v125_v29 }
 0x22d   :  { %v198_v31 = vpop.eup %197 }
 0x22e   :  { %v127_v32 = vmul.f32 0.6931472, %v198_v31 }
 0x230   :  { %v130_v34 = vadd.f32 %v129_v33, %v127_v32 }
 0x232   :  { %v135_v35 = vsel %vm134_vm4, %v130_v34, 0.0 }
 0x233   :  { %136 = vadd.xlane.f32.xlu1 %v135_v35 }
 0x2c0   :  { %v137_v40 = vpop.xlane.xlu1 %136 }
 0x2c1   :  { %v138_v41 = vrot.slane %v137_v40, 4 }
 0x2c3   :  { %v139_v42 = vadd.f32 %v138_v41, %v137_v40 }
 0x2c5   :  { %v140_v44 = vrot.slane %v139_v42, 2 }
 0x2c7   :  { %v141_v45 = vadd.f32 %v140_v44, %v139_v42 }
 0x2c9   :  { %v142_v47 = vrot.slane %v141_v45, 1 }
 0x2cb   :  { %v143_v48 = vadd.f32 %v142_v47, %v141_v45 }
 0x2cd   :  { %185 = vpush %v143_v48 }
 0x2ce   :  { %187 = vpush %v153_v49 }
 0x2fe   :  { %s186_s0 = spop %185 }
 0x2ff   :  { %v159_v50 = vstv %s186_s0  ;;  %s188_s20 = spop %187 }
 0x300   :  { %v157_v51 = vstv %s188_s20 }
 0x301   :  { %v158_v52 = vsel %vm156_vm6, %v157_v51, 0.0 }
 0x302   :  { %v160_v53 = vsel %vm155_vm7, %v159_v50, %v158_v52 }
 0x303   :  { %161 = vst [vmem:[#allocation5] sm:$0xff] %v160_v53 }
 0x304   :  { %232 = shalt.err (!%p229_p12)
}
 0x305   :  { %s233_s24 = scalar_lea.hbm %s297_s1, 128 }
 0x306   :  { %p234_p13 = scmp.ne.s32.totalorder %s297_s1, %s233_s24  ;;  %p237_p0 = scmp.lt.u32.totalorder %s233_s24, %s297_s1 }
 0x308   :  { %p239_p1 = pnand %p237_p0, %p234_p13 }
 0x30a   :  { %242 = shalt.err (!%p239_p1)
}
 0x30b   :  { %171 = dma.vmem_to_hbm [thread:$0]  %s169_s19, 128, %s297_s1, [#allocation4]  }
 0x30c   :  { %245 = dma.done.wait [#allocation4], 128  }
 0x30d   :  { %246 = vsyncadd [#allocation4], 4294967168 }
 0x30e   :  { %175 = vsyncpa [#allocation3], 1 }
 0x30f   :  { %176 = vsyncpa [#allocation4], 1 }

</bundles_post_ra>
